<compile_context>
chip_gen: v7x
topology: tpu7x:2x2x1
jax: 0.10.0
libtpu: 0.0.40
codegen_flags: <defaults>
</compile_context>

<pallas_src>
import jax
import jax.numpy as jnp
from jax.experimental import pallas as pl
from jax.experimental.pallas import tpu as pltpu


def encoder_kernel(x_ref, w1_ref, b1_ref, wheads_ref, bheads_ref,
                   mu_ref, sigma_ref):
    O = mu_ref.shape[1]

    x = x_ref[...]                                            # (TB, D_in)

    # Hidden layer + tanh (MXU matmul, tanh on EUP). Hidden dim is padded to a
    # lane-dense multiple of 128; padded columns are exactly tanh(0) = 0.
    h = jnp.tanh(
        jnp.dot(x, w1_ref[...], preferred_element_type=jnp.float32)
        + b1_ref[...]
    )                                                         # (TB, Hp)

    # Fused heads: one MXU pass produces [mu | logsigma]; padded hidden rows of
    # the weight are zero so they contribute nothing.
    heads = (
        jnp.dot(h, wheads_ref[...], preferred_element_type=jnp.float32)
        + bheads_ref[...]
    )                                                         # (TB, 2*O)

    mu_ref[...] = heads[:, :O].astype(mu_ref.dtype)
    sigma_ref[...] = jnp.exp(heads[:, O:]).astype(sigma_ref.dtype)


def _round_up(n, m):
    return ((n + m - 1) // m) * m


def prepare_params(params, dtype=jnp.float32):
    """One-time conversion of torch-convention (out, in) params to the fused,
    lane-padded kernel layout.  Do NOT call this per forward step."""
    w1 = params["w1"].T.astype(dtype)                          # (D_in, H)
    b1 = params["b1"].astype(dtype)                            # (H,)
    w_heads = jnp.concatenate(
        [params["wmu"].T, params["wls"].T], axis=1).astype(dtype)   # (H, 2*O)
    b_heads = jnp.concatenate(
        [params["bmu"], params["bls"]]).astype(dtype)          # (2*O,)

    # Pad hidden dim to a multiple of 128 with zeros (exact: tanh(0)=0 and the
    # corresponding w_heads rows are zero).
    H = w1.shape[1]
    Hp = _round_up(H, 128)
    if Hp != H:
        w1 = jnp.pad(w1, ((0, 0), (0, Hp - H)))
        b1 = jnp.pad(b1, (0, Hp - H))
        w_heads = jnp.pad(w_heads, ((0, Hp - H), (0, 0)))

    return {
        "w1": w1,                      # (D_in, Hp)
        "b1": b1[None, :],             # (1, Hp)
        "w_heads": w_heads,            # (Hp, 2*O)
        "b_heads": b_heads[None, :],   # (1, 2*O)
    }


def _choose_batch_tile(B, batch_tile):
    """Pick a sublane-aligned batch tile. For B >= 16 guarantee >= 2 grid
    steps so the 'parallel' axis can shard across v7x TensorCores."""
    if B > batch_tile:
        return batch_tile
    if B >= 16:
        return min(batch_tile, _round_up(pl.cdiv(B, 2), 8))
    return B                            # single full-extent block (tiny batch)


def encoder_forward(x, prep, *, batch_tile=4096):
    """x: (B, input_dim) float32. prep: output of prepare_params.
    Returns (mu, sigma), each (B, output_dim)."""
    B, D_in = x.shape
    w1, b1 = prep["w1"], prep["b1"]
    w_heads, b_heads = prep["w_heads"], prep["b_heads"]
    Hp = w1.shape[1]
    twoO = w_heads.shape[1]
    O = twoO // 2

    TB = _choose_batch_tile(B, batch_tile)
    grid = (pl.cdiv(B, TB),)             # ragged last block handled by Pallas

    mu, sigma = pl.pallas_call(
        encoder_kernel,
        out_shape=(
            jax.ShapeDtypeStruct((B, O), jnp.float32),
            jax.ShapeDtypeStruct((B, O), jnp.float32),
        ),
        grid=grid,
        in_specs=[
            pl.BlockSpec((TB, D_in), lambda i: (i, 0)),    # x (streamed)
            pl.BlockSpec((D_in, Hp), lambda i: (0, 0)),    # w1 (resident)
            pl.BlockSpec((1, Hp), lambda i: (0, 0)),       # b1 (resident)
            pl.BlockSpec((Hp, twoO), lambda i: (0, 0)),    # w_heads (resident)
            pl.BlockSpec((1, twoO), lambda i: (0, 0)),     # b_heads (resident)
        ],
        out_specs=(
            pl.BlockSpec((TB, O), lambda i: (i, 0)),       # mu
            pl.BlockSpec((TB, O), lambda i: (i, 0)),       # sigma
        ),
        compiler_params=pltpu.CompilerParams(
            dimension_semantics=("parallel",)),
    )(x, w1, b1, w_heads, b_heads)

    return mu, sigma


def init_params(key, input_dim, hidden_dim, output_dim):
    """Deterministic synthetic params, torch nn.Linear convention (out, in)."""
    ks = jax.random.split(key, 6)

    def lin(kw, kb, out_d, in_d):
        bound = 1.0 / (in_d ** 0.5)
        w = jax.random.uniform(kw, (out_d, in_d), jnp.float32, -bound, bound)
        b = jax.random.uniform(kb, (out_d,), jnp.float32, -bound, bound)
        return w, b

    w1, b1 = lin(ks[0], ks[1], hidden_dim, input_dim)
    wmu, bmu = lin(ks[2], ks[3], output_dim, hidden_dim)
    wls, bls = lin(ks[4], ks[5], output_dim, hidden_dim)
    return {"w1": w1, "b1": b1, "wmu": wmu, "bmu": bmu, "wls": wls, "bls": bls}


def encoder_ref(x, p):
    """Pure-JAX reference mirroring the torch forward."""
    h = jnp.tanh(x @ p["w1"].T + p["b1"])
    mu = h @ p["wmu"].T + p["bmu"]
    sigma = jnp.exp(h @ p["wls"].T + p["bls"])
    return mu, sigma


if __name__ == "__main__":
    key = jax.random.PRNGKey(0)
    kx, kp = jax.random.split(key)

    batch, input_dim, hidden_dim, output_dim = 8, 64, 32, 16
    x = jax.random.normal(kx, (batch, input_dim), jnp.float32)
    params = init_params(kp, input_dim, hidden_dim, output_dim)

    prep = prepare_params(params)       # one-time weight prep (no per-call work)
    mu, sigma = encoder_forward(x, prep)
    mu, sigma = jax.block_until_ready((mu, sigma))

    mu_ref, sigma_ref = encoder_ref(x, params)
    assert jnp.allclose(mu, mu_ref, atol=1e-5, rtol=1e-5), "mu mismatch"
    assert jnp.allclose(sigma, sigma_ref, atol=1e-5, rtol=1e-5), "sigma mismatch"

    print("KERNEL_OK")
</pallas_src>

<mosaic_0001>
module attributes {stable_mosaic.version = 11 : i64} {
  func.func @encoder_kernel(%arg0: i32, %arg1: memref<8x64xf32, #tpu.memory_space<vmem>>, %arg2: memref<64x128xf32, #tpu.memory_space<vmem>>, %arg3: memref<1x128xf32, #tpu.memory_space<vmem>>, %arg4: memref<128x32xf32, #tpu.memory_space<vmem>>, %arg5: memref<1x32xf32, #tpu.memory_space<vmem>>, %arg6: memref<8x16xf32, #tpu.memory_space<vmem>>, %arg7: memref<8x16xf32, #tpu.memory_space<vmem>>) attributes {dimension_semantics = [#tpu.dimension_semantics<parallel>], iteration_bounds = array<i64: 1>, scalar_prefetch = 0 : i64, scratch_operands = 0 : i64, tpu.core_type = #tpu.core_type<tc>, window_params = [{transform_indices = @transform_0, window_bounds = array<i64: 8, 64>}, {pipeline_mode = #tpu.pipeline_mode<synchronous>, transform_indices = @transform_1, window_bounds = array<i64: 64, 128>}, {pipeline_mode = #tpu.pipeline_mode<synchronous>, transform_indices = @transform_2, window_bounds = array<i64: 1, 128>}, {pipeline_mode = #tpu.pipeline_mode<synchronous>, transform_indices = @transform_3, window_bounds = array<i64: 128, 32>}, {pipeline_mode = #tpu.pipeline_mode<synchronous>, transform_indices = @transform_4, window_bounds = array<i64: 1, 32>}, {transform_indices = @transform_5, window_bounds = array<i64: 8, 16>}, {transform_indices = @transform_6, window_bounds = array<i64: 8, 16>}]} {
    %c0 = arith.constant 0 : index
    %c0_0 = arith.constant 0 : index
    %0 = vector.load %arg1[%c0, %c0_0] : memref<8x64xf32, #tpu.memory_space<vmem>>, vector<8x64xf32>
    %c0_1 = arith.constant 0 : index
    %c0_2 = arith.constant 0 : index
    %1 = vector.load %arg2[%c0_1, %c0_2] : memref<64x128xf32, #tpu.memory_space<vmem>>, vector<64x128xf32>
    %cst = arith.constant dense<0.000000e+00> : vector<8x128xf32>
    %2 = tpu.matmul %0, %1, %cst {dimension_numbers = #tpu.dot_dimension_numbers<[1], [0], [0], [1], [0, 0, 1, 1], [], []>} : vector<8x64xf32>, vector<64x128xf32>, vector<8x128xf32> -> vector<8x128xf32>
    %c0_3 = arith.constant 0 : index
    %c0_4 = arith.constant 0 : index
    %3 = vector.load %arg3[%c0_3, %c0_4] : memref<1x128xf32, #tpu.memory_space<vmem>>, vector<1x128xf32>
    %4 = vector.broadcast %3 : vector<1x128xf32> to vector<8x128xf32>
    %5 = arith.addf %2, %4 : vector<8x128xf32>
    %6 = math.tanh %5 : vector<8x128xf32>
    %c0_5 = arith.constant 0 : index
    %c0_6 = arith.constant 0 : index
    %7 = vector.load %arg4[%c0_5, %c0_6] : memref<128x32xf32, #tpu.memory_space<vmem>>, vector<128x32xf32>
    %cst_7 = arith.constant dense<0.000000e+00> : vector<8x32xf32>
    %8 = tpu.matmul %6, %7, %cst_7 {dimension_numbers = #tpu.dot_dimension_numbers<[1], [0], [0], [1], [0, 0, 1, 1], [], []>} : vector<8x128xf32>, vector<128x32xf32>, vector<8x32xf32> -> vector<8x32xf32>
    %c0_8 = arith.constant 0 : index
    %c0_9 = arith.constant 0 : index
    %9 = vector.load %arg5[%c0_8, %c0_9] : memref<1x32xf32, #tpu.memory_space<vmem>>, vector<1x32xf32>
    %10 = vector.broadcast %9 : vector<1x32xf32> to vector<8x32xf32>
    %11 = arith.addf %8, %10 : vector<8x32xf32>
    %12 = vector.extract_strided_slice %11 {offsets = [0, 0], sizes = [8, 16], strides = [1, 1]} : vector<8x32xf32> to vector<8x16xf32>
    %c0_10 = arith.constant 0 : index
    %c0_11 = arith.constant 0 : index
    %13 = vector.load %arg6[%c0_10, %c0_11] : memref<8x16xf32, #tpu.memory_space<vmem>>, vector<8x16xf32>
    tpu.vector_store %arg6[%c0_10, %c0_11], %12 {strides = array<i32>} : memref<8x16xf32, #tpu.memory_space<vmem>>, vector<8x16xf32>,
    %14 = vector.extract_strided_slice %11 {offsets = [0, 16], sizes = [8, 16], strides = [1, 1]} : vector<8x32xf32> to vector<8x16xf32>
    %15 = math.exp %14 : vector<8x16xf32>
    %c0_12 = arith.constant 0 : index
    %c0_13 = arith.constant 0 : index
    %16 = vector.load %arg7[%c0_12, %c0_13] : memref<8x16xf32, #tpu.memory_space<vmem>>, vector<8x16xf32>
    tpu.vector_store %arg7[%c0_12, %c0_13], %15 {strides = array<i32>} : memref<8x16xf32, #tpu.memory_space<vmem>>, vector<8x16xf32>,
    return
  }
  func.func @transform_0(%arg0: i32) -> (i32, i32) {
    %c0_i32 = arith.constant 0 : i32
    %c0_i32_0 = arith.constant 0 : i32
    return %arg0, %c0_i32 : i32, i32
  }
  func.func @transform_1(%arg0: i32) -> (i32, i32) {
    %c0_i32 = arith.constant 0 : i32
    %c0_i32_0 = arith.constant 0 : i32
    %c0_i32_1 = arith.constant 0 : i32
    return %c0_i32, %c0_i32_0 : i32, i32
  }
  func.func @transform_2(%arg0: i32) -> (i32, i32) {
    %c0_i32 = arith.constant 0 : i32
    %c0_i32_0 = arith.constant 0 : i32
    %c0_i32_1 = arith.constant 0 : i32
    return %c0_i32, %c0_i32_0 : i32, i32
  }
  func.func @transform_3(%arg0: i32) -> (i32, i32) {
    %c0_i32 = arith.constant 0 : i32
    %c0_i32_0 = arith.constant 0 : i32
    %c0_i32_1 = arith.constant 0 : i32
    return %c0_i32, %c0_i32_0 : i32, i32
  }
  func.func @transform_4(%arg0: i32) -> (i32, i32) {
    %c0_i32 = arith.constant 0 : i32
    %c0_i32_0 = arith.constant 0 : i32
    %c0_i32_1 = arith.constant 0 : i32
    return %c0_i32, %c0_i32_0 : i32, i32
  }
  func.func @transform_5(%arg0: i32) -> (i32, i32) {
    %c0_i32 = arith.constant 0 : i32
    %c0_i32_0 = arith.constant 0 : i32
    return %arg0, %c0_i32 : i32, i32
  }
  func.func @transform_6(%arg0: i32) -> (i32, i32) {
    %c0_i32 = arith.constant 0 : i32
    %c0_i32_0 = arith.constant 0 : i32
    return %arg0, %c0_i32 : i32, i32
  }
}

</mosaic_0001>

<bundles_post_ra>
// kernel: tpu_custom_call.1
= control target key start
LH: loop header
LB: loop body
LE: loop exit
PB: predicated region body
PF: predicated region fallthrough
CT: control target
= control target key end

     0   :  { %12 = vsyncpa [#allocation3], 0  ;;  %v422_v3 = vmov 0.0|0.0   ;;  %vm423_vm0 = vmmov 0   ;;  %v424_v6 = vmov 0.0   ;;  %s582_s0 = inlined_call_operand.vmem [shape: f32[8,64], index: 0, kind: input, shape index: {}]   ;;  %s583_s1 = inlined_call_operand.vmem [shape: f32[64,128], index: 1, kind: input, shape index: {}]   ;;  %s584_s2 = inlined_call_operand.vmem [shape: f32[1,128], index: 2, kind: input, shape index: {}]   ;;  %s585_s3 = inlined_call_operand.vmem [shape: f32[128,32], index: 3, kind: input, shape index: {}]   ;;  %s586_s4 = inlined_call_operand.vmem [shape: f32[1,32], index: 4, kind: input, shape index: {}]   ;;  %s587_s5 = inlined_call_operand.hbm [shape: f32[8,16], index: 5, kind: output, shape index: {0}]   ;;  %s588_s6 = inlined_call_operand.hbm [shape: f32[8,16], index: 6, kind: output, shape index: {1}]  }
   0x1   :  { %v25_v0 = vld [vmem:[%s583_s1] sm:$0xff]  ;;  %v26_v1 = vld [vmem:[%s583_s1 + $0x8] sm:$0xff]  ;;  %v27_v2 = vld [vmem:[%s583_s1 + $0x10] sm:$0xff]  ;;  %328 = vmatprep.subr.bf16.mxu0 %v422_v3  ;;  %290 = vmatprep.mubr.msk.f32.mxu0 %vm423_vm0, %v424_v6 }
   0x2   :  { %v329_v4 = vpack.c.bf16 %v26_v1, %v25_v0  ;;  %v28_v5 = vld [vmem:[%s583_s1 + $0x18] sm:$0xff]  ;;  %340 = vmatprep.subr.bf16.mxu1 %v422_v3  ;;  %325 = vmatprep.mubr.msk.f32.mxu1 %vm423_vm0, %v424_v6  ;;  %v115_v8 = vld [vmem:[%s585_s3] sm:$0xff]  ;;  %v116_v9 = vld [vmem:[%s585_s3 + $0x8] sm:$0xff] }
   0x3   :  { %v332_v7 = vpack.c.bf16 %v28_v5, %v27_v2  ;;  %v117_v10 = vld [vmem:[%s585_s3 + $0x10] sm:$0xff]  ;;  %v29_v11 = vld [vmem:[%s583_s1 + $0x20] sm:$0xff]  ;;  %v30_v12 = vld [vmem:[%s583_s1 + $0x28] sm:$0xff]  ;;  %v341_v13 = vpack.c.bf16 %v116_v9, %v115_v8 }
   0x4   :  { %330 = vmatpush3.bf16.msra.mxu0 %v329_v4  ;;  %v118_v14 = vld [vmem:[%s585_s3 + $0x18] sm:$0xff] }
   0x5   :  { %331 = vmatprep.subr.bf16.mxu0 %v422_v3  ;;  %342 = vmatpush3.bf16.msra.mxu1 %v341_v13  ;;  %v344_v15 = vpack.c.bf16 %v118_v14, %v117_v10 }
   0x6   :  { %13 = vsyncpa [#allocation5], 0  ;;  %v335_v16 = vpack.c.bf16 %v30_v12, %v29_v11  ;;  %343 = vmatprep.subr.bf16.mxu1 %v422_v3  ;;  %v119_v17 = vld [vmem:[%s585_s3 + $0x20] sm:$0xff]  ;;  %v120_v18 = vld [vmem:[%s585_s3 + $0x28] sm:$0xff]  ;;  %vm40_vm1 = vcmask 523264   ;;  %vm208_vm2 = vcmask 130048  }
   0x7   :  { %v31_v19 = vld [vmem:[%s583_s1 + $0x30] sm:$0xff]  ;;  %v32_v20 = vld [vmem:[%s583_s1 + $0x38] sm:$0xff]  ;;  %v347_v21 = vpack.c.bf16 %v120_v18, %v119_v17  ;;  %v24_v26 = vld [vmem:[%s582_s0] sm:$0xff] }
   0x8   :  { %333 = vmatpush3.bf16.msra.mxu0 %v332_v7  ;;  %v338_v22 = vpack.c.bf16 %v32_v20, %v31_v19  ;;  %v121_v23 = vld [vmem:[%s585_s3 + $0x30] sm:$0xff]  ;;  %v122_v24 = vld [vmem:[%s585_s3 + $0x38] sm:$0xff]  ;;  %v123_v27 = vld [vmem:[%s585_s3 + $0x40] sm:$0xff] }
   0x9   :  { %334 = vmatprep.subr.bf16.mxu0 %v422_v3  ;;  %345 = vmatpush3.bf16.msra.mxu1 %v344_v15  ;;  %v350_v25 = vpack.c.bf16 %v122_v24, %v121_v23  ;;  %v124_v28 = vld [vmem:[%s585_s3 + $0x48] sm:$0xff]  ;;  %v125_v30 = vld [vmem:[%s585_s3 + $0x50] sm:$0xff]  ;;  %v126_v31 = vld [vmem:[%s585_s3 + $0x58] sm:$0xff] }
   0xa   :  { %346 = vmatprep.subr.bf16.mxu1 %v422_v3  ;;  %v353_v29 = vpack.c.bf16 %v124_v28, %v123_v27  ;;  %v356_v32 = vpack.c.bf16 %v126_v31, %v125_v30  ;;  %v127_v33 = vld [vmem:[%s585_s3 + $0x60] sm:$0xff]  ;;  %v128_v34 = vld [vmem:[%s585_s3 + $0x68] sm:$0xff]  ;;  %v129_v36 = vld [vmem:[%s585_s3 + $0x70] sm:$0xff] }
   0xb   :  { %v359_v35 = vpack.c.bf16 %v128_v34, %v127_v33  ;;  %v130_v37 = vld [vmem:[%s585_s3 + $0x78] sm:$0xff]  ;;  %v245_v39 = vld [vmem:[%s584_s2] ss:$0 sm:$0xff]  ;;  %s425_s3 = smov [#allocation2]  }
   0xc   :  { %336 = vmatpush3.bf16.msra.mxu0 %v335_v16  ;;  %v362_v38 = vpack.c.bf16 %v130_v37, %v129_v36  ;;  %v247_v44 = vld [vmem:[%s586_s4] ss:$0 sm:$0xff]  ;;  %s223_s25 = sshll.u32 %s425_s3, 4  ;;  %s224_s25 = int_to_ptr.vmem [resolvable:$true] %s223_s25 }
   0xd   :  { %337 = vmatprep.subr.bf16.mxu0 %v422_v3  ;;  %348 = vmatpush3.bf16.msra.mxu1 %v347_v21  ;;  %s374_s2 = scalar_lea.vmem %s224_s25, 128  ;;  %p379_p1 = scmp.lt.s32.totalorder %s224_s25, %s224_s25 }
   0xe   :  { %349 = vmatprep.subr.bf16.mxu1 %v422_v3  ;;  %p375_p0 = scmp.ne.s32.totalorder %s224_s25, %s374_s2  ;;  %p380_p2 = scmp.lt.s32.totalorder %s374_s2, %s374_s2 }
  0x10   :  { %339 = vmatpush3.bf16.msra.mxu0 %v338_v22  ;;  %p381_p3 = por %p380_p2, %p379_p1 }
  0x11   :  { %351 = vmatpush3.bf16.msra.mxu1 %v350_v25 }
  0x12   :  { %352 = vmatprep.subr.bf16.mxu1 %v422_v3  ;;  %p382_p4 = pnand %p381_p3, %p375_p0 }
  0x13   :  { %291 = vmatmul.mubr.msk.f32.vlgmr.msra.gmra.mrb[0].mxu0 %vm40_vm1, %v24_v26 }
  0x15   :  { %354 = vmatpush3.bf16.msra.mxu1 %v353_v29 }
  0x16   :  { %355 = vmatprep.subr.bf16.mxu1 %v422_v3 }
  0x19   :  { %357 = vmatpush3.bf16.msra.mxu1 %v356_v32 }
  0x1a   :  { %358 = vmatprep.subr.bf16.mxu1 %v422_v3 }
  0x1d   :  { %360 = vmatpush3.bf16.msra.mxu1 %v359_v35 }
  0x1e   :  { %361 = vmatprep.subr.bf16.mxu1 %v422_v3 }
  0x21   :  { %363 = vmatpush3.bf16.msra.mxu1 %v362_v38 }
  0xe6   :  { %v110_v40 = vpop.f32.mrb[0].mxu0 }
  0xe7   :  { %v111_v41 = vadd.f32 %v245_v39, %v110_v40  ;;  %v292_v42 = vpop.f32.mrb[1].mxu0 }
  0xe9   :  { %370 = vtanh.f32 %v111_v41 }
  0xf3   :  { %v371_v43 = vpop.eup %370 }
  0xf4   :  { %326 = vmatmul.mubr.f32.vlgmr.msra.gmra.mrb[0].mxu1 %v371_v43 }
 0x1c7   :  { %v204_v45 = vpop.f32.mrb[0].mxu1 }
 0x1c8   :  { %v205_v46 = vadd.f32 %v247_v44, %v204_v45  ;;  %v327_v47 = vpop.f32.mrb[1].mxu1 }
 0x1ca   :  { %v210_v48 = vmul.f32 1.442695, %v205_v46  ;;  %209 = vst.msk [vmem:[#allocation2] sm:$0xff] %vm208_vm2, %v205_v46 }
 0x1cb   :  { %385 = shalt.err (!%p382_p4)
}
 0x1cc   :  { %s386_s4 = scalar_lea.hbm %s587_s5, 128 }
 0x1cd   :  { %p387_p5 = scmp.ne.s32.totalorder %s587_s5, %s386_s4  ;;  %p390_p6 = scmp.lt.u32.totalorder %s386_s4, %s587_s5 }
 0x1cf   :  { %p392_p7 = pnand %p390_p6, %p387_p5 }
 0x1d1   :  { %395 = shalt.err (!%p392_p7)
}
 0x1d2   :  { %226 = dma.vmem_to_hbm [thread:$0]  %s224_s25, 128, %s587_s5, [#allocation3]   ;;  %372 = vpow2.f32 %v210_v48 }
 0x1d3   :  { %s426_s9 = smov 112   ;;  %s427_s0 = smov [#allocation4]  }
 0x1d4   :  { %s233_s10 = sshll.u32 %s427_s0, 4  ;;  %s234_s10 = int_to_ptr.vmem [resolvable:$true] %s233_s10 }
 0x1d5   :  { %s396_s11 = scalar_lea.vmem %s234_s10, 128  ;;  %p401_p9 = scmp.lt.s32.totalorder %s234_s10, %s234_s10 }
 0x1d6   :  { %p397_p8 = scmp.ne.s32.totalorder %s234_s10, %s396_s11  ;;  %p402_p10 = scmp.lt.s32.totalorder %s396_s11, %s396_s11 }
 0x1d8   :  { %p403_p11 = por %p402_p10, %p401_p9 }
 0x1da   :  { %p404_p12 = pnand %p403_p11, %p397_p8 }
 0x1dc   :  { %v373_v49 = vpop.eup %372 }
 0x1dd   :  { %213 = vrot.lane.b32.xlu0 %v373_v49, %s426_s9 }
 0x24f   :  { %v214_v50 = vpop.permute.xlu0 %213 }
 0x250   :  { %216 = vst.msk [vmem:[#allocation4] sm:$0xff] %vm208_vm2, %v214_v50 }
 0x251   :  { %407 = shalt.err (!%p404_p12)
}
 0x252   :  { %s408_s5 = scalar_lea.hbm %s588_s6, 128 }
 0x253   :  { %p409_p13 = scmp.ne.s32.totalorder %s588_s6, %s408_s5  ;;  %p412_p0 = scmp.lt.u32.totalorder %s408_s5, %s588_s6 }
 0x255   :  { %p414_p1 = pnand %p412_p0, %p409_p13 }
 0x257   :  { %417 = shalt.err (!%p414_p1)
}
 0x258   :  { %236 = dma.vmem_to_hbm [thread:$0]  %s234_s10, 128, %s588_s6, [#allocation5]  }
 0x259   :  { %418 = dma.done.wait [#allocation3], 128  }
 0x25a   :  { %419 = vsyncadd [#allocation3], 4294967168 }
 0x25b   :  { %420 = dma.done.wait [#allocation5], 128  }
 0x25c   :  { %421 = vsyncadd [#allocation5], 4294967168 }
 0x25d   :  { %243 = vsyncpa [#allocation3], 1 }
 0x25e   :  { %244 = vsyncpa [#allocation5], 1 }

</bundles_post_ra>
